<compile_context>
chip_gen: v7x
topology: tpu7x:2x2x1
jax: 0.10.0
libtpu: 0.0.40
codegen_flags: <defaults>
</compile_context>

<pallas_src>
import math
import jax
import jax.numpy as jnp
from jax import lax
from jax.experimental import pallas as pl
from jax.experimental.pallas import tpu as pltpu

P_DROP = 0.01


def _attn_kernel(x1_ref, k_ref, v_ref, mask_ref, o_ref):
    # x1_ref: (B, C, S, D)  k_ref: (B0, D)  v_ref: (B, S, V)
    # mask_ref: (B*S, B0) holding {0, 1/(1-p)}  o_ref: (B, B0, V)
    B, C, S, D = x1_ref.shape

    # q = x1.mean(dim=1), fused with the 1/sqrt(D) attention scale into one
    # compile-time constant; flatten batch+seq so the matmul is one MXU pass.
    scale = 1.0 / (C * math.sqrt(D))
    q = (jnp.sum(x1_ref[...], axis=1) * scale).reshape(B * S, D)

    # qk = q @ k.T  (contract feature dim D) -> (B*S, B0)
    qk = lax.dot_general(
        q, k_ref[...],
        dimension_numbers=(((1,), (1,)), ((), ())),
        preferred_element_type=jnp.float32)

    # softmax over last dim
    m = jnp.max(qk, axis=-1, keepdims=True)
    e = jnp.exp(qk - m)
    sm = e / jnp.sum(e, axis=-1, keepdims=True)

    # dropout(p=0.01): mask already holds 0 or 1/(1-p) (host-side RNG).
    dq = (sm * mask_ref[...]).reshape(B, S, -1)

    # dropout_qk.transpose(1, 2) @ v  -> (B, B0, V)
    out = jnp.einsum('bsk,bsv->bkv', dq, v_ref[...],
                     preferred_element_type=jnp.float32)

    o_ref[...] = out.astype(o_ref.dtype)


def _dropout_mask(seed, shape):
    keep = jax.random.uniform(jax.random.PRNGKey(seed), shape) >= P_DROP
    return jnp.where(keep, 1.0 / (1.0 - P_DROP), 0.0).astype(jnp.float32)


def model_forward(x1, x2, x3, seed=0):
    B, C, S, D = x1.shape
    B0 = x2.shape[0]
    k = x2.reshape(B0, -1)          # glue: torch .view(x2.shape[0], -1)
    assert k.shape[1] == D, "flattened x2 must match q's feature dim"
    assert x3.shape[0] == B and x3.shape[1] == S
    V = x3.shape[2]

    # Dropout keep-mask (pre-scaled), generated outside the kernel.
    # TODO(synk): bitwise parity with torch's dropout RNG is not reproducible.
    mask = _dropout_mask(seed, (B * S, B0))

    out = pl.pallas_call(
        _attn_kernel,
        out_shape=jax.ShapeDtypeStruct((B, B0, V), jnp.float32),
        grid=(1,),                                  # whole problem, one step
        in_specs=[
            pl.BlockSpec((B, C, S, D), lambda i: (0, 0, 0, 0)),
            pl.BlockSpec((B0, D),      lambda i: (0, 0)),
            pl.BlockSpec((B, S, V),    lambda i: (0, 0, 0)),
            pl.BlockSpec((B * S, B0),  lambda i: (0, 0)),
        ],
        out_specs=pl.BlockSpec((B, B0, V), lambda i: (0, 0, 0)),
        compiler_params=pltpu.CompilerParams(
            dimension_semantics=("arbitrary",)),
    )(x1, k, x3, mask)

    # torch .squeeze(-1): only removes the dim when V == 1
    if V == 1:
        out = out[..., 0]
    return out


def _reference(x1, x2, x3, mask2d):
    B, C, S, D = x1.shape
    q = x1.mean(axis=1)
    k = x2.reshape(x2.shape[0], -1)
    qk = jnp.einsum('bsd,nd->bsn', q, k) / math.sqrt(D)
    sm = jax.nn.softmax(qk, axis=-1)
    dq = sm * mask2d.reshape(B, S, -1)
    out = jnp.einsum('bsk,bsv->bkv', dq, x3)
    return out


if __name__ == "__main__":
    key = jax.random.PRNGKey(0)
    k1, k2, k3 = jax.random.split(key, 3)

    B, C, S, D = 2, 4, 8, 32      # x1: batch, reduced dim, seq, feature
    B0, V = 4, 16                 # x2 leading dim, value dim

    x1 = jax.random.normal(k1, (B, C, S, D), dtype=jnp.float32)
    x2 = jax.random.normal(k2, (B0, 8, 4), dtype=jnp.float32)   # flattens to (B0, 32) == (B0, D)
    x3 = jax.random.normal(k3, (B, S, V), dtype=jnp.float32)

    out = model_forward(x1, x2, x3, seed=0)
    jax.block_until_ready(out)
    assert out.shape == (B, B0, V)

    ref = _reference(x1, x2, x3, _dropout_mask(0, (B * S, B0)))
    assert jnp.allclose(out, ref, atol=1e-4, rtol=1e-4)

    print("KERNEL_OK")
</pallas_src>

<mosaic_0001>
module attributes {stable_mosaic.version = 11 : i64} {
  func.func @_attn_kernel(%arg0: i32, %arg1: memref<2x4x8x32xf32, #tpu.memory_space<vmem>>, %arg2: memref<4x32xf32, #tpu.memory_space<vmem>>, %arg3: memref<2x8x16xf32, #tpu.memory_space<vmem>>, %arg4: memref<16x4xf32, #tpu.memory_space<vmem>>, %arg5: memref<2x4x16xf32, #tpu.memory_space<vmem>>) attributes {dimension_semantics = [#tpu.dimension_semantics<arbitrary>], iteration_bounds = array<i64: 1>, scalar_prefetch = 0 : i64, scratch_operands = 0 : i64, tpu.core_type = #tpu.core_type<tc>, window_params = [{pipeline_mode = #tpu.pipeline_mode<synchronous>, transform_indices = @transform_0, window_bounds = array<i64: 2, 4, 8, 32>}, {pipeline_mode = #tpu.pipeline_mode<synchronous>, transform_indices = @transform_1, window_bounds = array<i64: 4, 32>}, {pipeline_mode = #tpu.pipeline_mode<synchronous>, transform_indices = @transform_2, window_bounds = array<i64: 2, 8, 16>}, {pipeline_mode = #tpu.pipeline_mode<synchronous>, transform_indices = @transform_3, window_bounds = array<i64: 16, 4>}, {pipeline_mode = #tpu.pipeline_mode<synchronous>, transform_indices = @transform_4, window_bounds = array<i64: 2, 4, 16>}]} {
    %c0 = arith.constant 0 : index
    %c0_0 = arith.constant 0 : index
    %c0_1 = arith.constant 0 : index
    %c0_2 = arith.constant 0 : index
    %0 = vector.load %arg1[%c0, %c0_0, %c0_1, %c0_2] : memref<2x4x8x32xf32, #tpu.memory_space<vmem>>, vector<2x4x8x32xf32>
    %cst = arith.constant dense<0.000000e+00> : vector<2x8x32xf32>
    %1 = vector.multi_reduction <add>, %0, %cst [1] : vector<2x4x8x32xf32> to vector<2x8x32xf32>
    %cst_3 = arith.constant 0.0441941731 : f32
    %2 = vector.broadcast %cst_3 : f32 to vector<2x8x32xf32>
    %3 = arith.mulf %1, %2 : vector<2x8x32xf32>
    %4 = vector.shape_cast %3 : vector<2x8x32xf32> to vector<16x32xf32>
    %c0_4 = arith.constant 0 : index
    %c0_5 = arith.constant 0 : index
    %5 = vector.load %arg2[%c0_4, %c0_5] : memref<4x32xf32, #tpu.memory_space<vmem>>, vector<4x32xf32>
    %cst_6 = arith.constant dense<0.000000e+00> : vector<16x4xf32>
    %6 = tpu.matmul %4, %5, %cst_6 {dimension_numbers = #tpu.dot_dimension_numbers<[1], [1], [0], [0], [0, 0, 1, 0], [], []>} : vector<16x32xf32>, vector<4x32xf32>, vector<16x4xf32> -> vector<16x4xf32>
    %cst_7 = arith.constant dense<0xFF800000> : vector<16xf32>
    %7 = vector.multi_reduction <maximumf>, %6, %cst_7 [1] : vector<16x4xf32> to vector<16xf32>
    %8 = vector.shape_cast %7 : vector<16xf32> to vector<16x1xf32>
    %9 = vector.broadcast %8 : vector<16x1xf32> to vector<16x4xf32>
    %10 = arith.subf %6, %9 : vector<16x4xf32>
    %11 = math.exp %10 : vector<16x4xf32>
    %cst_8 = arith.constant dense<0.000000e+00> : vector<16xf32>
    %12 = vector.multi_reduction <add>, %11, %cst_8 [1] : vector<16x4xf32> to vector<16xf32>
    %13 = vector.shape_cast %12 : vector<16xf32> to vector<16x1xf32>
    %14 = vector.broadcast %13 : vector<16x1xf32> to vector<16x4xf32>
    %15 = arith.divf %11, %14 : vector<16x4xf32>
    %c0_9 = arith.constant 0 : index
    %c0_10 = arith.constant 0 : index
    %16 = vector.load %arg4[%c0_9, %c0_10] : memref<16x4xf32, #tpu.memory_space<vmem>>, vector<16x4xf32>
    %17 = arith.mulf %15, %16 : vector<16x4xf32>
    %18 = vector.shape_cast %17 : vector<16x4xf32> to vector<2x8x4xf32>
    %c0_11 = arith.constant 0 : index
    %c0_12 = arith.constant 0 : index
    %c0_13 = arith.constant 0 : index
    %19 = vector.load %arg3[%c0_11, %c0_12, %c0_13] : memref<2x8x16xf32, #tpu.memory_space<vmem>>, vector<2x8x16xf32>
    "tpu.trace_start"() <{level = 10 : i32, message = "bsk,bsv->bkv"}> : () -> ()
    %cst_14 = arith.constant dense<0.000000e+00> : vector<2x4x16xf32>
    %20 = tpu.matmul %18, %19, %cst_14 {dimension_numbers = #tpu.dot_dimension_numbers<[1], [1], [2], [2], [0, 0, 0, 2, 1, 2], [0], [0]>} : vector<2x8x4xf32>, vector<2x8x16xf32>, vector<2x4x16xf32> -> vector<2x4x16xf32>
    "tpu.trace_stop"() : () -> ()
    %c0_15 = arith.constant 0 : index
    %c0_16 = arith.constant 0 : index
    %c0_17 = arith.constant 0 : index
    %21 = vector.load %arg5[%c0_15, %c0_16, %c0_17] : memref<2x4x16xf32, #tpu.memory_space<vmem>>, vector<2x4x16xf32>
    tpu.vector_store %arg5[%c0_15, %c0_16, %c0_17], %20 {strides = array<i32>} : memref<2x4x16xf32, #tpu.memory_space<vmem>>, vector<2x4x16xf32>,
    return
  }
  func.func @transform_0(%arg0: i32) -> (i32, i32, i32, i32) {
    %c0_i32 = arith.constant 0 : i32
    %c0_i32_0 = arith.constant 0 : i32
    %c0_i32_1 = arith.constant 0 : i32
    %c0_i32_2 = arith.constant 0 : i32
    %c0_i32_3 = arith.constant 0 : i32
    return %c0_i32, %c0_i32_0, %c0_i32_1, %c0_i32_2 : i32, i32, i32, i32
  }
  func.func @transform_1(%arg0: i32) -> (i32, i32) {
    %c0_i32 = arith.constant 0 : i32
    %c0_i32_0 = arith.constant 0 : i32
    %c0_i32_1 = arith.constant 0 : i32
    return %c0_i32, %c0_i32_0 : i32, i32
  }
  func.func @transform_2(%arg0: i32) -> (i32, i32, i32) {
    %c0_i32 = arith.constant 0 : i32
    %c0_i32_0 = arith.constant 0 : i32
    %c0_i32_1 = arith.constant 0 : i32
    %c0_i32_2 = arith.constant 0 : i32
    return %c0_i32, %c0_i32_0, %c0_i32_1 : i32, i32, i32
  }
  func.func @transform_3(%arg0: i32) -> (i32, i32) {
    %c0_i32 = arith.constant 0 : i32
    %c0_i32_0 = arith.constant 0 : i32
    %c0_i32_1 = arith.constant 0 : i32
    return %c0_i32, %c0_i32_0 : i32, i32
  }
  func.func @transform_4(%arg0: i32) -> (i32, i32, i32) {
    %c0_i32 = arith.constant 0 : i32
    %c0_i32_0 = arith.constant 0 : i32
    %c0_i32_1 = arith.constant 0 : i32
    %c0_i32_2 = arith.constant 0 : i32
    return %c0_i32, %c0_i32_0, %c0_i32_1 : i32, i32, i32
  }
}

</mosaic_0001>

<bundles_post_ra>
// kernel: tpu_custom_call.1
= control target key start
LH: loop header
LB: loop body
LE: loop exit
PB: predicated region body
PF: predicated region fallthrough
CT: control target
= control target key end

     0   :  { %9 = vsyncpa [#allocation3], 0  ;;  %s583_s0 = inlined_call_operand.hbm [shape: f32[2,4,8,32], index: 0, kind: input, shape index: {}]   ;;  %s584_s1 = inlined_call_operand.vmem [shape: f32[4,32], index: 1, kind: input, shape index: {}]   ;;  %s585_s2 = inlined_call_operand.vmem [shape: f32[2,8,16], index: 2, kind: input, shape index: {}]   ;;  %s586_s3 = inlined_call_operand.vmem [shape: f32[16,4], index: 3, kind: input, shape index: {}]   ;;  %s587_s4 = inlined_call_operand.hbm [shape: f32[2,4,16], index: 4, kind: output, shape index: {}]  }
   0x1   :  { %10 = vsyncpa [#allocation4], 0  ;;  %s493_s15 = smov [#allocation2]   ;;  %s445_s19 = scalar_lea.hbm %s583_s0, 1024 }
   0x2   :  { %s16_s16 = sshll.u32 %s493_s15, 4  ;;  %p446_p0 = scmp.ne.s32.totalorder %s583_s0, %s445_s19  ;;  %s17_s16 = int_to_ptr.vmem [resolvable:$true] %s16_s16 }
   0x3   :  { %p449_p1 = scmp.lt.u32.totalorder %s445_s19, %s583_s0 }
   0x5   :  { %p451_p2 = pnand %p449_p1, %p446_p0 }
   0x7   :  { %454 = shalt.err (!%p451_p2)
}
   0x8   :  { %s455_s24 = scalar_lea.vmem %s17_s16, 1024  ;;  %p460_p4 = scmp.lt.s32.totalorder %s17_s16, %s17_s16 }
   0x9   :  { %p456_p3 = scmp.ne.s32.totalorder %s17_s16, %s455_s24  ;;  %p461_p5 = scmp.lt.s32.totalorder %s455_s24, %s455_s24 }
   0xb   :  { %p462_p6 = por %p461_p5, %p460_p4 }
   0xd   :  { %p463_p7 = pnand %p462_p6, %p456_p3 }
   0xf   :  { %466 = shalt.err (!%p463_p7)
}
  0x10   :  { %s494_s25 = smov 128   ;;  %s495_s26 = smov 8  }
  0x11   :  { %22 = dma.hbm_to_vmem [thread:$0]  %s583_s0, 1024, %s17_s16, [#allocation3], %s494_s25, %s494_s25, %s495_s26  }
  0x12   :  { %489 = dma.done.wait [#allocation3], 1024  }
  0x13   :  { %490 = vsyncadd [#allocation3], 4294966272  ;;  %vm40_vm0 = vcmask 261120   ;;  %v57_v0 = vld [vmem:[%s584_s1] sm:$0xf]  ;;  %v33_v2 = vld [vmem:[#allocation2 + $0x8] sm:$0xff] }
  0x14   :  { %v32_v1 = vld [vmem:[#allocation2] sm:$0xff]  ;;  %414 = vmatprep.subr.msk.mxu0 %vm40_vm0, %v57_v0  ;;  %v34_v3 = vld [vmem:[#allocation2 + $0x10] sm:$0xff]  ;;  %v35_v4 = vld [vmem:[#allocation2 + $0x18] sm:$0xff]  ;;  %v42_v6 = vsel %vm40_vm0, %v33_v2, 0.0  ;;  %vm142_vm1 = vcmask 31744   ;;  %v496_v40 = vmov 0.0  }
  0x15   :  { %v41_v5 = vsel %vm40_vm0, %v32_v1, 0.0  ;;  %v36_v7 = vld [vmem:[#allocation2 + $0x20] sm:$0xff]  ;;  %415 = vmatpush3.xpose.msk.msra.mxu0 %vm40_vm0, %v57_v0  ;;  %v44_v9 = vsel %vm40_vm0, %v34_v3, 0.0  ;;  %v37_v10 = vld [vmem:[#allocation2 + $0x28] sm:$0xff]  ;;  %v38_v11 = vld [vmem:[#allocation2 + $0x30] sm:$0xff]  ;;  %v46_v14 = vsel %vm40_vm0, %v35_v4, 0.0  ;;  %419 = vmatprep.subr.mxu1 %v496_v40 }
  0x16   :  { %v43_v8 = vadd.f32 %v42_v6, %v41_v5  ;;  %v39_v12 = vld [vmem:[#allocation2 + $0x38] sm:$0xff]  ;;  %v48_v13 = vsel %vm40_vm0, %v36_v7, 0.0  ;;  %v49_v15 = vsel %vm40_vm0, %v37_v10, 0.0  ;;  %v51_v16 = vsel %vm40_vm0, %v38_v11, 0.0  ;;  %v169_v39 = vld [vmem:[%s585_s2] sm:$0xff]  ;;  %v166_v48 = vld [vmem:[%s586_s3 + $0x8] sm:$0xff] }
  0x17   :  { %v50_v18 = vadd.f32 %v49_v15, %v48_v13  ;;  %v53_v19 = vsel %vm40_vm0, %v39_v12, 0.0  ;;  %vm497_vm2 = vmmov 0   ;;  %420 = vmatpush3.msra.mxu1 %v169_v39  ;;  %v165_v44 = vld [vmem:[%s586_s3] sm:$0xff]  ;;  %vm203_vm3 = vcmask 64512   ;;  %v170_v51 = vld [vmem:[%s585_s2 + $0x8] sm:$0xff]  ;;  %s498_s11 = smov [#allocation5]  }
  0x18   :  { %v45_v17 = vadd.f32 %v44_v9, %v43_v8  ;;  %421 = vmatprep.mubr.msk.f32.mxu1 %vm497_vm2, %v496_v40  ;;  %424 = vmatprep.subr.mxu1 %v496_v40  ;;  %vm382_vm4 = vcmask 125952   ;;  %s390_s12 = sshll.u32 %s498_s11, 4  ;;  %s391_s12 = int_to_ptr.vmem [resolvable:$true] %s390_s12 }
  0x19   :  { %v52_v21 = vadd.f32 %v51_v16, %v50_v18  ;;  %s467_s3 = scalar_lea.vmem %s391_s12, 128  ;;  %p472_p9 = scmp.lt.s32.totalorder %s391_s12, %s391_s12 }
  0x1a   :  { %v47_v20 = vadd.f32 %v46_v14, %v45_v17  ;;  %p468_p8 = scmp.ne.s32.totalorder %s391_s12, %s467_s3  ;;  %p473_p10 = scmp.lt.s32.totalorder %s467_s3, %s467_s3 }
  0x1b   :  { %v54_v23 = vadd.f32 %v53_v19, %v52_v21 }
  0x1c   :  { %v55_v22 = vmul.f32 0.044194173, %v47_v20  ;;  %p474_p11 = por %p473_p10, %p472_p9 }
  0x1d   :  { %v56_v24 = vmul.f32 0.044194173, %v54_v23 }
  0x1e   :  { %416 = vmatprep.mubr.msk.f32.mxu0 %vm40_vm0, %v55_v22  ;;  %p475_p12 = pnand %p474_p11, %p468_p8 }
  0x1f   :  { %417 = vmatmul.mubr.msk.f32.vlgmr.msra.gmra.mrb[0].mxu0 %vm40_vm0, %v56_v24 }
  0xf2   :  { %v418_v25 = vpop.f32.mrb[0].mxu0 }
  0xf3   :  { %v133_v26 = vpop.f32.mrb[1].mxu0  ;;  %v146_v28 = vsel %vm142_vm1, %v418_v25, -inf }
  0xf4   :  { %v143_v27 = vsel %vm142_vm1, %v133_v26, -inf }
  0xf5   :  { %144 = vmax.xlane.f32.xlu0 %v143_v27 }
  0xf9   :  { %147 = vmax.xlane.f32.xlu0 %v146_v28 }
 0x182   :  { %v145_v29 = vpop.xlane.xlu0 %144 }
 0x183   :  { %v149_v30 = vsub.f32 %v133_v26, %v145_v29 }
 0x185   :  { %v151_v31 = vmul.f32 1.442695, %v149_v30 }
 0x186   :  { %v148_v32 = vpop.xlane.xlu0 %147 }
 0x187   :  { %437 = vpow2.f32 %v151_v31  ;;  %v150_v33 = vsub.f32 %v418_v25, %v148_v32 }
 0x189   :  { %v153_v34 = vmul.f32 1.442695, %v150_v33 }
 0x18b   :  { %439 = vpow2.f32 %v153_v34 }
 0x191   :  { %v438_v35 = vpop.eup %437 }
 0x192   :  { %v155_v36 = vsel %vm142_vm1, %v438_v35, 0.0 }
 0x193   :  { %156 = vadd.xlane.f32.xlu1 %v155_v36 }
 0x195   :  { %v440_v37 = vpop.eup %439 }
 0x196   :  { %v158_v38 = vsel %vm142_vm1, %v440_v37, 0.0 }
 0x197   :  { %159 = vadd.xlane.f32.xlu1 %v158_v38 }
 0x220   :  { %v157_v41 = vpop.xlane.xlu1 %156 }
 0x221   :  { %441 = vrcp.f32 %v157_v41 }
 0x224   :  { %v160_v42 = vpop.xlane.xlu1 %159 }
 0x225   :  { %443 = vrcp.f32 %v160_v42 }
 0x22b   :  { %v442_v43 = vpop.eup %441 }
 0x22c   :  { %v162_v45 = vmul.f32 %v442_v43, %v438_v35 }
 0x22e   :  { %v167_v46 = vmul.f32 %v165_v44, %v162_v45 }
 0x22f   :  { %v444_v47 = vpop.eup %443 }
 0x230   :  { %171 = vxpose.xlu0.b32.start.end [1/1] (short) (narrow) %v167_v46, 8  ;;  %v164_v49 = vmul.f32 %v444_v47, %v440_v37 }
 0x232   :  { %v168_v50 = vmul.f32 %v166_v48, %v164_v49 }
 0x234   :  { %277 = vxpose.xlu1.b32.start.end [1/1] (short) (narrow) %v168_v50, 8 }
 0x2b0   :  { %v187_v52 = vpop.trf.xlu0 }
 0x2b1   :  { %422 = vmatmul.mubr.msk.f32.vlgmr.msra.gmra.mrb[0].mxu1 %vm203_vm3, %v187_v52 }
 0x2b2   :  { %425 = vmatpush3.msra.mxu1 %v170_v51  ;;  %426 = vmatprep.mubr.msk.f32.mxu1 %vm497_vm2, %v496_v40 }
 0x2b4   :  { %v293_v53 = vpop.trf.xlu1 }
 0x2b5   :  { %427 = vmatmul.mubr.msk.f32.vlgmr.msra.gmra.mrb[2].mxu1 %vm203_vm3, %v293_v53 }
 0x384   :  { %v273_v54 = vpop.f32.mrb[0].mxu1 }
 0x385   :  { %383 = vst.msk [vmem:[#allocation5] sm:$0xf] %vm382_vm4, %v273_v54  ;;  %v423_v55 = vpop.f32.mrb[1].mxu1 }
 0x388   :  { %v378_v56 = vpop.f32.mrb[2].mxu1 }
 0x389   :  { %384 = vst.msk [vmem:[#allocation5 + $0x4] sm:$0xf] %vm382_vm4, %v378_v56  ;;  %v428_v57 = vpop.f32.mrb[3].mxu1 }
 0x38a   :  { %478 = shalt.err (!%p475_p12)
}
 0x38b   :  { %s479_s14 = scalar_lea.hbm %s587_s4, 128 }
 0x38c   :  { %p480_p13 = scmp.ne.s32.totalorder %s587_s4, %s479_s14  ;;  %p483_p0 = scmp.lt.u32.totalorder %s479_s14, %s587_s4 }
 0x38e   :  { %p485_p1 = pnand %p483_p0, %p480_p13 }
 0x390   :  { %488 = shalt.err (!%p485_p1)
}
 0x391   :  { %s499_s19 = smov 64   ;;  %s500_s20 = smov 4  }
 0x392   :  { %396 = dma.vmem_to_hbm [thread:$0]  %s391_s12, 128, %s587_s4, [#allocation4], %s499_s19, %s499_s19, %s500_s20  }
 0x393   :  { %491 = dma.done.wait [#allocation4], 128  }
 0x394   :  { %492 = vsyncadd [#allocation4], 4294967168 }
 0x395   :  { %400 = vsyncpa [#allocation3], 1 }
 0x396   :  { %401 = vsyncpa [#allocation4], 1 }

</bundles_post_ra>
